<compile_context>
chip_gen: v7x
topology: tpu7x:2x2x1
jax: 0.10.0
libtpu: 0.0.40
codegen_flags: <defaults>
</compile_context>

<pallas_src>
import functools

import jax
import jax.numpy as jnp
from jax.experimental import pallas as pl
from jax.experimental.pallas import tpu as pltpu


# --------------------------------------------------------------------------- #
# helpers
# --------------------------------------------------------------------------- #
def _round_up(x, m):
    return (x + m - 1) // m * m


def _largest_divisor(n, candidates):
    for c in candidates:
        if n % c == 0:
            return c
    return n


def _is_v7x():
    try:
        kind = jax.devices()[0].device_kind.lower().replace(" ", "")
        return ("v7" in kind) or ("tpu7" in kind)
    except Exception:
        return False


def _vmem_limit_bytes():
    try:
        cap = int(pltpu.get_tpu_info().vmem_capacity_bytes)
    except Exception:
        cap = 64 * 1024 * 1024  # conservative (v7x per-TC size)
    # ~96 MiB on 128 MiB parts (v5e/v6e), ~48 MiB on v7x's 64 MiB.
    return min(cap * 3 // 4, 100 * 1024 * 1024)


def _select_tm(mb, sublane):
    """mb is batch rounded up to `sublane`. Minimize padded-M waste, then prefer
    larger tiles (fewer weight re-streams)."""
    if mb <= 512:
        return mb  # single M block, zero padding waste, one weight pass
    best_tm, best_mp = None, None
    for c in (512, 256, 128):
        mp = _round_up(mb, c)
        if best_mp is None or mp < best_mp or (mp == best_mp and c > best_tm):
            best_tm, best_mp = c, mp
    return best_tm


# --------------------------------------------------------------------------- #
# kernel
# --------------------------------------------------------------------------- #
def _bcos_kernel(x_ref, w_ref, invx_ref, *rest, b, max_out, tn, has_col_scale):
    if has_col_scale:
        invw_ref, o_ref, acc_ref = rest
    else:
        o_ref, acc_ref = rest

    k = pl.program_id(2)

    @pl.when(k == 0)
    def _():
        acc_ref[...] = jnp.zeros_like(acc_ref)

    # One fused MXU matmul covering all max_out groups (lane axis = max_out*tn).
    acc_ref[...] += jnp.dot(x_ref[...], w_ref[...],
                            preferred_element_type=jnp.float32)

    @pl.when(k == pl.num_programs(2) - 1)
    def _():
        acc = acc_ref[...]                              # (tm, max_out*tn) f32
        out = acc[:, 0:tn]
        for m in range(1, max_out):                     # lane-aligned static slices
            out = jnp.maximum(out, acc[:, m * tn:(m + 1) * tn])
        if b != 1:
            inv_norm = invx_ref[...]                    # (tm, 1) f32, precomputed
            if has_col_scale:                           # normalize_weights=False
                inv_norm = inv_norm * invw_ref[...]     # -> (tm, tn)
            if b == 2:
                out = out * (jnp.abs(out) * inv_norm)
            else:
                out = out * (jnp.abs(out * inv_norm) ** (b - 1))
        o_ref[...] = out.astype(o_ref.dtype)


# --------------------------------------------------------------------------- #
# one-time weight preparation (per layer, NOT per forward call)
# --------------------------------------------------------------------------- #
def prepare_bcos_weights(weight, *, out_features=None, max_out=1,
                         normalize_weights=True, matmul_dtype=None):
    """Normalize rows, build the fused lane-dense (Kp, max_out*Np) layout whose
    column blocks match the kernel's N tiling, pad to (8,128)-aligned shapes and
    cast to the matmul dtype.  Amortized over all forward calls of the layer."""
    n_rows, in_features = weight.shape
    if out_features is None:
        assert n_rows % max_out == 0
        out_features = n_rows // max_out
    assert n_rows == out_features * max_out
    if not normalize_weights:
        assert max_out == 1, "normalize_weights=False requires max_out == 1"

    if matmul_dtype is None:
        matmul_dtype = jnp.bfloat16 if weight.dtype == jnp.float32 else weight.dtype
    matmul_dtype = jnp.dtype(matmul_dtype)

    D, K, M = out_features, in_features, max_out
    Kp = _round_up(K, 128)
    Np = _round_up(D, 128)
    tn = _largest_divisor(Np, (512, 256, 128))
    n_tiles = Np // tn

    w32 = weight.astype(jnp.float32)
    inv_w_norm = 1.0 / jnp.maximum(jnp.sqrt(jnp.sum(w32 * w32, axis=1)), 1e-12)
    w_n = w32 * inv_w_norm[:, None]                     # normalized rows

    # PyTorch row order is d*max_out + m  ->  (D, M, K), then fused columns
    # ordered as  j_tile*(M*tn) + m*tn + d_in_tile  with K on the sublane axis.
    w_dmk = w_n.reshape(D, M, K)
    w_pad = jnp.zeros((Np, M, Kp), jnp.float32).at[:D, :, :K].set(w_dmk)
    w_fused = (w_pad.reshape(n_tiles, tn, M, Kp)
               .transpose(3, 0, 2, 1)
               .reshape(Kp, n_tiles * M * tn)
               .astype(matmul_dtype))

    inv_w_cols = None
    if not normalize_weights:                           # max_out == 1 here
        inv_w_cols = jnp.zeros((1, Np), jnp.float32).at[0, :D].set(inv_w_norm)

    return dict(w_fused=w_fused, inv_w_cols=inv_w_cols,
                in_features=K, out_features=D, max_out=M,
                Kp=Kp, Np=Np, tn=tn, matmul_dtype=matmul_dtype)


# --------------------------------------------------------------------------- #
# per-call apply
# --------------------------------------------------------------------------- #
def bcos_linear_apply(x, prep, *, b=2, normalize_weights=True):
    K, D, M = prep["in_features"], prep["out_features"], prep["max_out"]
    Kp, Np, tn = prep["Kp"], prep["Np"], prep["tn"]
    mm_dtype = prep["matmul_dtype"]
    w_fused = prep["w_fused"]
    inv_w_cols = prep["inv_w_cols"]
    has_col_scale = not normalize_weights
    if has_col_scale:
        assert inv_w_cols is not None and M == 1

    *lead, kin = x.shape
    assert kin == K
    x2 = x.reshape(-1, K)
    batch = x2.shape[0]
    out_dtype = x.dtype

    # Dynamic-norm term: one fused O(M*K) pass in the wrapper (not per N tile).
    x32 = x2.astype(jnp.float32)
    inv_x = jax.lax.rsqrt(jnp.sum(x32 * x32, axis=-1, keepdims=True) + 1e-6)

    in_bytes = jnp.dtype(mm_dtype).itemsize
    out_bytes = jnp.dtype(out_dtype).itemsize

    # ---- tile selection (VMEM- and sublane-packing-aware) ----
    sublane = 16 if in_bytes == 2 else (32 if in_bytes == 1 else 8)
    mb = _round_up(batch, sublane)
    tm = _select_tm(mb, sublane)
    # v7x has 2 TensorCores: guarantee >=2 "parallel" grid blocks when possible.
    if _is_v7x() and (mb // tm <= 1) and (Np // tn <= 1) and mb > sublane:
        tm = _round_up((mb + 1) // 2, sublane)
    Mp = _round_up(mb, tm)

    vmem_limit = _vmem_limit_bytes()
    budget = int(vmem_limit * 0.7)
    tn_f = M * tn
    tk = 128
    for cand in (1024, 512, 256, 128):
        if Kp % cand:
            continue
        fp = (2 * tm * cand * in_bytes            # x, double-buffered
              + 2 * cand * tn_f * in_bytes        # fused weight
              + 2 * tm * 4 + 2 * tn * 4           # inv_x / inv_w columns
              + 2 * tm * tn * out_bytes           # output
              + tm * tn_f * 4)                    # f32 accumulator scratch
        if fp <= budget:
            tk = cand
            break

    # ---- padded, lane-dense operands (skipped when already aligned) ----
    if (Mp, Kp) == (batch, K):
        xp = x2.astype(mm_dtype)
        invx_p = inv_x
    else:
        xp = jnp.zeros((Mp, Kp), mm_dtype).at[:batch, :K].set(x2.astype(mm_dtype))
        invx_p = jnp.zeros((Mp, 1), jnp.float32).at[:batch].set(inv_x)

    grid = (Mp // tm, Np // tn, Kp // tk)

    kernel = functools.partial(_bcos_kernel, b=b, max_out=M, tn=tn,
                               has_col_scale=has_col_scale)

    in_specs = [
        pl.BlockSpec((tm, tk), lambda i, j, k: (i, k)),      # x
        pl.BlockSpec((tk, tn_f), lambda i, j, k: (k, j)),    # fused weight
        pl.BlockSpec((tm, 1), lambda i, j, k: (i, 0)),       # inv ||x||
    ]
    operands = [xp, w_fused, invx_p]
    if has_col_scale:
        in_specs.append(pl.BlockSpec((1, tn), lambda i, j, k: (0, j)))
        operands.append(inv_w_cols)

    cost = pl.CostEstimate(
        flops=2 * Mp * Kp * Np * M,
        transcendentals=(Mp * Np if b not in (1, 2) else 0),
        bytes_accessed=(xp.size * in_bytes * (Np // tn)
                        + w_fused.size * in_bytes * (Mp // tm)
                        + Mp * Np * out_bytes + Mp * 4))

    out = pl.pallas_call(
        kernel,
        out_shape=jax.ShapeDtypeStruct((Mp, Np), out_dtype),
        grid_spec=pltpu.PrefetchScalarGridSpec(
            num_scalar_prefetch=0,
            grid=grid,
            in_specs=in_specs,
            out_specs=pl.BlockSpec((tm, tn), lambda i, j, k: (i, j)),
            scratch_shapes=[pltpu.VMEM((tm, tn_f), jnp.float32)],
        ),
        compiler_params=pltpu.CompilerParams(
            dimension_semantics=("parallel", "parallel", "arbitrary"),
            vmem_limit_bytes=vmem_limit),
        cost_estimate=cost,
    )(*operands)

    out = out[:batch, :D]
    return out.reshape(*lead, D)


def bcos_linear(x, weight, *, b=2, max_out=1, out_features=None,
                normalize_weights=True, matmul_dtype=None):
    """Convenience wrapper: prepare weights (normally done once per layer) + apply."""
    prep = prepare_bcos_weights(weight, out_features=out_features, max_out=max_out,
                                normalize_weights=normalize_weights,
                                matmul_dtype=matmul_dtype)
    return bcos_linear_apply(x, prep, b=b, normalize_weights=normalize_weights)


# --------------------------------------------------------------------------- #
# references
# --------------------------------------------------------------------------- #
def _reference_exact(x, weight, *, b=2, max_out=1, out_features=None,
                     normalize_weights=True):
    """Pure-JAX f32 reference mirroring the PyTorch module."""
    if out_features is None:
        out_features = weight.shape[0] // max_out
    w_n = weight / jnp.linalg.norm(weight, axis=1, keepdims=True)
    out = jnp.matmul(x, w_n.T, precision=jax.lax.Precision.HIGHEST)
    if max_out > 1:
        out = out.reshape(*out.shape[:-1], out_features, max_out).max(axis=-1)
    if b == 1:
        return out
    norm = jnp.sqrt(jnp.sum(x * x, axis=-1, keepdims=True) + 1e-6)
    if not normalize_weights:
        norm = norm * jnp.linalg.norm(weight, axis=1)
    if b == 2:
        dyn = jnp.abs(out) / norm
    else:
        dyn = jnp.abs(out / norm) ** (b - 1)
    return dyn * out


def _reference_matched(x, weight, *, b, max_out, out_features,
                       normalize_weights, matmul_dtype):
    """Mirrors the kernel's numerics (reciprocal-multiply normalization, low-precision
    matmul operands with f32 accumulation, rsqrt input norm)."""
    D = out_features
    w32 = weight.astype(jnp.float32)
    inv_w = 1.0 / jnp.maximum(jnp.sqrt(jnp.sum(w32 * w32, axis=1)), 1e-12)
    w_n = (w32 * inv_w[:, None]).astype(matmul_dtype)
    xm = x.astype(matmul_dtype)
    out = jnp.matmul(xm, w_n.T, preferred_element_type=jnp.float32)
    if max_out > 1:
        out = out.reshape(*out.shape[:-1], D, max_out).max(axis=-1)
    if b == 1:
        return out.astype(x.dtype)
    x32 = x.astype(jnp.float32)
    inv_norm = jax.lax.rsqrt(jnp.sum(x32 * x32, axis=-1, keepdims=True) + 1e-6)
    if not normalize_weights:
        inv_norm = inv_norm * inv_w[None, :]
    if b == 2:
        out = out * (jnp.abs(out) * inv_norm)
    else:
        out = out * (jnp.abs(out * inv_norm) ** (b - 1))
    return out.astype(x.dtype)


# --------------------------------------------------------------------------- #
# self-test
# --------------------------------------------------------------------------- #
if __name__ == "__main__":
    key = jax.random.PRNGKey(0)

    configs = [
        dict(batch=8, in_features=32, out_features=16, max_out=1, b=2,
             normalize_weights=True),
        dict(batch=6, in_features=48, out_features=20, max_out=2, b=2.5,
             normalize_weights=True),
        dict(batch=8, in_features=32, out_features=16, max_out=1, b=2,
             normalize_weights=False),
        # multi-tile case: several N tiles + several K steps + maxout
        dict(batch=160, in_features=640, out_features=384, max_out=2, b=2,
             normalize_weights=True),
    ]

    for cfg in configs:
        key, kx, kw = jax.random.split(key, 3)
        batch = cfg["batch"]
        in_features = cfg["in_features"]
        out_features = cfg["out_features"]
        max_out = cfg["max_out"]
        nw = cfg["normalize_weights"]

        x = jax.random.normal(kx, (batch, in_features), dtype=jnp.float32)
        bound = 1.0 / (in_features ** 0.5)
        weight = jax.random.uniform(
            kw, (out_features * max_out, in_features),
            minval=-bound, maxval=bound, dtype=jnp.float32)

        prep = prepare_bcos_weights(weight, out_features=out_features,
                                    max_out=max_out, normalize_weights=nw)
        out = bcos_linear_apply(x, prep, b=cfg["b"], normalize_weights=nw)
        out = jax.block_until_ready(out)
        assert out.shape == (batch, out_features), cfg

        ref_m = _reference_matched(x, weight, b=cfg["b"], max_out=max_out,
                                   out_features=out_features,
                                   normalize_weights=nw,
                                   matmul_dtype=prep["matmul_dtype"])
        assert jnp.allclose(out, ref_m, atol=1e-3, rtol=1e-3), cfg

        ref_e = _reference_exact(x, weight, b=cfg["b"], max_out=max_out,
                                 out_features=out_features,
                                 normalize_weights=nw)
        assert jnp.allclose(out, ref_e, atol=5e-2, rtol=5e-2), cfg

    # explicit full-f32 MXU path + leading batch dims
    key, kx, kw = jax.random.split(key, 3)
    x3 = jax.random.normal(kx, (2, 3, 48), dtype=jnp.float32)
    bound = 1.0 / (48 ** 0.5)
    w3 = jax.random.uniform(kw, (40, 48), minval=-bound, maxval=bound,
                            dtype=jnp.float32)
    out3 = bcos_linear(x3, w3, b=2, max_out=2, out_features=20,
                       matmul_dtype=jnp.float32)
    out3 = jax.block_until_ready(out3)
    assert out3.shape == (2, 3, 20)
    ref3 = _reference_exact(x3, w3, b=2, max_out=2, out_features=20)
    assert jnp.allclose(out3, ref3, atol=1e-2, rtol=1e-2)

    print("KERNEL_OK")
</pallas_src>

<mosaic_0001>
module attributes {stable_mosaic.version = 11 : i64} {
  func.func @_bcos_kernel(%arg0: i32, %arg1: i32, %arg2: i32, %arg3: memref<16x128xbf16, #tpu.memory_space<vmem>>, %arg4: memref<128x128xbf16, #tpu.memory_space<vmem>>, %arg5: memref<16x1xf32, #tpu.memory_space<vmem>>, %arg6: memref<16x128xf32, #tpu.memory_space<vmem>>, %arg7: memref<16x128xf32, #tpu.memory_space<vmem>>) attributes {dimension_semantics = [#tpu.dimension_semantics<parallel>, #tpu.dimension_semantics<parallel>, #tpu.dimension_semantics<arbitrary>], iteration_bounds = array<i64: 1, 1, 1>, scalar_prefetch = 0 : i64, scratch_operands = 1 : i64, tpu.core_type = #tpu.core_type<tc>, window_params = [{transform_indices = @transform_0, window_bounds = array<i64: 16, 128>}, {transform_indices = @transform_1, window_bounds = array<i64: 128, 128>}, {transform_indices = @transform_2, window_bounds = array<i64: 16, 1>}, {transform_indices = @transform_3, window_bounds = array<i64: 16, 128>}]} {
    %c0_i32 = arith.constant 0 : i32
    %0 = arith.cmpi eq, %arg2, %c0_i32 : i32
    %1 = arith.extui %0 : i1 to i32
    %c0_i32_0 = arith.constant 0 : i32
    %2 = arith.cmpi ne, %1, %c0_i32_0 : i32
    scf.if %2 {
      %cst_10 = arith.constant 0.000000e+00 : f32
      %12 = vector.broadcast %cst_10 : f32 to vector<16x128xf32>
      %c0_11 = arith.constant 0 : index
      %c0_12 = arith.constant 0 : index
      %13 = vector.load %arg7[%c0_11, %c0_12] : memref<16x128xf32, #tpu.memory_space<vmem>>, vector<16x128xf32>
      tpu.vector_store %arg7[%c0_11, %c0_12], %12 {strides = array<i32>} : memref<16x128xf32, #tpu.memory_space<vmem>>, vector<16x128xf32>,
    } else {
    }
    %c0 = arith.constant 0 : index
    %c0_1 = arith.constant 0 : index
    %3 = vector.load %arg7[%c0, %c0_1] : memref<16x128xf32, #tpu.memory_space<vmem>>, vector<16x128xf32>
    %c0_2 = arith.constant 0 : index
    %c0_3 = arith.constant 0 : index
    %4 = vector.load %arg3[%c0_2, %c0_3] : memref<16x128xbf16, #tpu.memory_space<vmem>>, vector<16x128xbf16>
    %c0_4 = arith.constant 0 : index
    %c0_5 = arith.constant 0 : index
    %5 = vector.load %arg4[%c0_4, %c0_5] : memref<128x128xbf16, #tpu.memory_space<vmem>>, vector<128x128xbf16>
    %cst = arith.constant dense<0.000000e+00> : vector<16x128xf32>
    %6 = tpu.matmul %4, %5, %cst {dimension_numbers = #tpu.dot_dimension_numbers<[1], [0], [0], [1], [0, 0, 1, 1], [], []>} : vector<16x128xbf16>, vector<128x128xbf16>, vector<16x128xf32> -> vector<16x128xf32>
    %7 = arith.addf %3, %6 : vector<16x128xf32>
    %c0_6 = arith.constant 0 : index
    %c0_7 = arith.constant 0 : index
    %8 = vector.load %arg7[%c0_6, %c0_7] : memref<16x128xf32, #tpu.memory_space<vmem>>, vector<16x128xf32>
    tpu.vector_store %arg7[%c0_6, %c0_7], %7 {strides = array<i32>} : memref<16x128xf32, #tpu.memory_space<vmem>>, vector<16x128xf32>,
    %c0_i32_8 = arith.constant 0 : i32
    %9 = arith.cmpi eq, %arg2, %c0_i32_8 : i32
    %10 = arith.extui %9 : i1 to i32
    %c0_i32_9 = arith.constant 0 : i32
    %11 = arith.cmpi ne, %10, %c0_i32_9 : i32
    scf.if %11 {
      %c0_10 = arith.constant 0 : index
      %c0_11 = arith.constant 0 : index
      %12 = vector.load %arg7[%c0_10, %c0_11] : memref<16x128xf32, #tpu.memory_space<vmem>>, vector<16x128xf32>
      %c0_12 = arith.constant 0 : index
      %c0_13 = arith.constant 0 : index
      %13 = vector.load %arg5[%c0_12, %c0_13] : memref<16x1xf32, #tpu.memory_space<vmem>>, vector<16x1xf32>
      %14 = math.absf %12 : vector<16x128xf32>
      %15 = vector.broadcast %13 : vector<16x1xf32> to vector<16x128xf32>
      %16 = arith.mulf %14, %15 : vector<16x128xf32>
      %17 = arith.mulf %12, %16 : vector<16x128xf32>
      %c0_14 = arith.constant 0 : index
      %c0_15 = arith.constant 0 : index
      %18 = vector.load %arg6[%c0_14, %c0_15] : memref<16x128xf32, #tpu.memory_space<vmem>>, vector<16x128xf32>
      tpu.vector_store %arg6[%c0_14, %c0_15], %17 {strides = array<i32>} : memref<16x128xf32, #tpu.memory_space<vmem>>, vector<16x128xf32>,
    } else {
    }
    return
  }
  func.func @transform_0(%arg0: i32, %arg1: i32, %arg2: i32) -> (i32, i32) {
    %c0_i32 = arith.constant 0 : i32
    return %arg0, %arg2 : i32, i32
  }
  func.func @transform_1(%arg0: i32, %arg1: i32, %arg2: i32) -> (i32, i32) {
    %c0_i32 = arith.constant 0 : i32
    return %arg2, %arg1 : i32, i32
  }
  func.func @transform_2(%arg0: i32, %arg1: i32, %arg2: i32) -> (i32, i32) {
    %c0_i32 = arith.constant 0 : i32
    %c0_i32_0 = arith.constant 0 : i32
    return %arg0, %c0_i32 : i32, i32
  }
  func.func @transform_3(%arg0: i32, %arg1: i32, %arg2: i32) -> (i32, i32) {
    %c0_i32 = arith.constant 0 : i32
    return %arg0, %arg1 : i32, i32
  }
}

</mosaic_0001>

<bundles_post_ra>
// kernel: tpu_custom_call.1
= control target key start
LH: loop header
LB: loop body
LE: loop exit
PB: predicated region body
PF: predicated region fallthrough
CT: control target
= control target key end

     0   :  { %8 = vsyncpa [#allocation4], 0  ;;  %s364_s0 = inlined_call_operand.vmem [shape: bf16[16,128], index: 0, kind: input, shape index: {}]   ;;  %s365_s1 = inlined_call_operand.hbm [shape: bf16[128,128], index: 1, kind: input, shape index: {}]   ;;  %s366_s2 = inlined_call_operand.vmem [shape: f32[16,1], index: 2, kind: input, shape index: {}]   ;;  %s367_s3 = inlined_call_operand.hbm [shape: f32[16,128], index: 3, kind: output, shape index: {}]  }
   0x1   :  { %9 = vsyncpa [#allocation5], 0  ;;  %s302_s12 = smov [#allocation3]   ;;  %s254_s16 = scalar_lea.hbm %s365_s1, 1024 }
   0x2   :  { %s17_s13 = sshll.u32 %s302_s12, 4  ;;  %p255_p0 = scmp.ne.s32.totalorder %s365_s1, %s254_s16  ;;  %s18_s13 = int_to_ptr.vmem [resolvable:$true] %s17_s13 }
   0x3   :  { %p258_p1 = scmp.lt.u32.totalorder %s254_s16, %s365_s1 }
   0x5   :  { %p260_p2 = pnand %p258_p1, %p255_p0 }
   0x7   :  { %263 = shalt.err (!%p260_p2)
}
   0x8   :  { %s264_s21 = scalar_lea.vmem %s18_s13, 1024  ;;  %p269_p4 = scmp.lt.s32.totalorder %s18_s13, %s18_s13 }
   0x9   :  { %p265_p3 = scmp.ne.s32.totalorder %s18_s13, %s264_s21  ;;  %p270_p5 = scmp.lt.s32.totalorder %s264_s21, %s264_s21 }
   0xb   :  { %p271_p6 = por %p270_p5, %p269_p4 }
   0xd   :  { %p272_p7 = pnand %p271_p6, %p265_p3 }
   0xf   :  { %275 = shalt.err (!%p272_p7)
}
  0x10   :  { %s303_s22 = smov 64   ;;  %s304_s23 = smov 4  }
  0x11   :  { %23 = dma.hbm_to_vmem [thread:$0]  %s365_s1, 1024, %s18_s13, [#allocation4], %s303_s22, %s303_s22, %s304_s23  }
  0x12   :  { %298 = dma.done.wait [#allocation4], 1024  }
  0x13   :  { %299 = vsyncadd [#allocation4], 4294966272  ;;  %v305_v0 = vmov 0.0   ;;  %vm306_vm0 = vmmov 0   ;;  %v307_v1 = vmov 0   ;;  %v245_v2 = vld [vmem:[#allocation3] sm:$0xff]  }
  0x14   :  { %215 = vmatprep.subr.bf16.mxu0 %v305_v0  ;;  %231 = vmatprep.mubr.msk.bf16.mxu0 %vm306_vm0, %v305_v0  ;;  %v246_v3 = vld [vmem:[#allocation3 + $0x8] sm:$0xff]   ;;  %v247_v4 = vld [vmem:[#allocation3 + $0x10] sm:$0xff]   ;;  %v160_v5 = vld [vmem:[%s366_s2] sm:$0xff] }
  0x15   :  { %244 = vset.pattern.permute.xlu0 %v307_v1  ;;  %216 = vmatpush3.bf16.msra.mxu0 %v245_v2  ;;  %v248_v6 = vld [vmem:[#allocation3 + $0x18] sm:$0xff]   ;;  %v161_v7 = vld [vmem:[%s366_s2 + $0x8] sm:$0xff]  ;;  %v249_v8 = vld [vmem:[#allocation3 + $0x20] sm:$0xff]   ;;  %s308_s2 = smov [#allocation6]  }
  0x16   :  { %217 = vmatprep.subr.bf16.mxu0 %v305_v0  ;;  %166 = vperm.xlu0 %244, %v160_v5   ;;  %v250_v9 = vld [vmem:[#allocation3 + $0x28] sm:$0xff]   ;;  %v251_v10 = vld [vmem:[#allocation3 + $0x30] sm:$0xff]   ;;  %v252_v11 = vld [vmem:[#allocation3 + $0x38] sm:$0xff]   ;;  %s185_s4 = sshll.u32 %s308_s2, 4  ;;  %s186_s4 = int_to_ptr.vmem [resolvable:$true] %s185_s4 }
  0x17   :  { %v253_v12 = vld [vmem:[%s364_s0] sm:$0xff]   ;;  %s276_s0 = scalar_lea.vmem %s186_s4, 256  ;;  %p281_p9 = scmp.lt.s32.totalorder %s186_s4, %s186_s4 }
  0x18   :  { %p277_p8 = scmp.ne.s32.totalorder %s186_s4, %s276_s0  ;;  %p282_p10 = scmp.lt.s32.totalorder %s276_s0, %s276_s0 }
  0x19   :  { %218 = vmatpush3.bf16.msra.mxu0 %v246_v3 }
  0x1a   :  { %219 = vmatprep.subr.bf16.mxu0 %v305_v0  ;;  %171 = vperm.xlu0 %244, %v161_v7   ;;  %p283_p11 = por %p282_p10, %p281_p9 }
  0x1c   :  { %p284_p12 = pnand %p283_p11, %p277_p8 }
  0x1d   :  { %220 = vmatpush3.bf16.msra.mxu0 %v247_v4 }
  0x1e   :  { %221 = vmatprep.subr.bf16.mxu0 %v305_v0 }
  0x21   :  { %222 = vmatpush3.bf16.msra.mxu0 %v248_v6 }
  0x22   :  { %223 = vmatprep.subr.bf16.mxu0 %v305_v0 }
  0x25   :  { %224 = vmatpush3.bf16.msra.mxu0 %v249_v8 }
  0x26   :  { %225 = vmatprep.subr.bf16.mxu0 %v305_v0 }
  0x29   :  { %226 = vmatpush3.bf16.msra.mxu0 %v250_v9 }
  0x2a   :  { %227 = vmatprep.subr.bf16.mxu0 %v305_v0 }
  0x2d   :  { %228 = vmatpush3.bf16.msra.mxu0 %v251_v10 }
  0x2e   :  { %229 = vmatprep.subr.bf16.mxu0 %v305_v0 }
  0x31   :  { %230 = vmatpush3.bf16.msra.mxu0 %v252_v11 }
  0x34   :  { %232 = vmatmul.mubr.bf16.vlgmr.msra.gmra.mrb[0].mxu0 %v253_v12 }
  0x95   :  { %v167_v13 = vpop.permute.xlu0 %166 }
  0x99   :  { %v172_v21 = vpop.permute.xlu0 %171 }
 0x107   :  { %v144_v14 = vpop.f32.mrb[0].mxu0 }
 0x108   :  { %v162_v15 = vand.u32 2147483647, %v144_v14  ;;  %v233_v16 = vpop.f32.mrb[1].mxu0 }
 0x109   :  { %v147_v17 = vpop.f32.mrb[2].mxu0 }
 0x10a   :  { %v174_v18 = vmul.f32 %v167_v13, %v162_v15  ;;  %v163_v19 = vand.u32 2147483647, %v147_v17  ;;  %v234_v20 = vpop.f32.mrb[3].mxu0 }
 0x10c   :  { %v176_v22 = vmul.f32 %v174_v18, %v144_v14  ;;  %v175_v23 = vmul.f32 %v172_v21, %v163_v19 }
 0x10e   :  { %178 = vst [vmem:[#allocation6] sm:$0xff] %v176_v22  ;;  %v177_v24 = vmul.f32 %v175_v23, %v147_v17 }
 0x110   :  { %179 = vst [vmem:[#allocation6 + $0x8] sm:$0xff] %v177_v24 }
 0x111   :  { %287 = shalt.err (!%p284_p12)
}
 0x112   :  { %s288_s7 = scalar_lea.hbm %s367_s3, 256 }
 0x113   :  { %p289_p13 = scmp.ne.s32.totalorder %s367_s3, %s288_s7  ;;  %p292_p0 = scmp.lt.u32.totalorder %s288_s7, %s367_s3 }
 0x115   :  { %p294_p1 = pnand %p292_p0, %p289_p13 }
 0x117   :  { %297 = shalt.err (!%p294_p1)
}
 0x118   :  { %s309_s12 = smov 128   ;;  %s310_s13 = smov 8  }
 0x119   :  { %191 = dma.vmem_to_hbm [thread:$0]  %s186_s4, 256, %s367_s3, [#allocation5], %s309_s12, %s309_s12, %s310_s13  }
 0x11a   :  { %300 = dma.done.wait [#allocation5], 256  }
 0x11b   :  { %301 = vsyncadd [#allocation5], 4294967040 }
 0x11c   :  { %195 = vsyncpa [#allocation4], 1 }
 0x11d   :  { %196 = vsyncpa [#allocation5], 1 }

</bundles_post_ra>
